<compile_context>
chip_gen: v6e
topology: v6e:2x2x1
jax: 0.10.0
libtpu: 0.0.40
codegen_flags: <defaults>
</compile_context>

<pallas_src>
import math

import jax
import jax.numpy as jnp
from jax.experimental import pallas as pl
from jax.experimental.pallas import tpu as pltpu

NOISE_SCALE = 5000.0
LN_EPS = 1e-5


def _round_up(n, m):
    return ((n + m - 1) // m) * m


# --------------------------------------------------- one-time parameter prep
def prepare_params(p):
    """Hoisted, one-time parameter preparation (NOT per forward call).

    * MXU weights stored bf16 (halves weight HBM->VMEM traffic; the cast
      happens once here, not per call).
    * scale & shift head weights concatenated -> one [H, 2M] matmul.
    * Ten tiny bias/gamma/beta vectors packed into one [10, W] f32 slab.
    * Sinusoidal frequency table precomputed (the PyTorch register_buffer).
    """
    E, H = p["w1t"].shape
    M = p["wd1t"].shape[1]
    f32, bf16 = jnp.float32, jnp.bfloat16
    W = max(H, 2 * M, E)

    def row(v):
        v = jnp.asarray(v, f32).reshape(1, -1)
        return jnp.pad(v, ((0, 0), (0, W - v.shape[1])))

    vecs = jnp.concatenate(
        [row(p["b1"]), row(p["b2"]),
         row(jnp.concatenate([p["bs"], p["bsh"]], axis=-1)),
         row(p["g1"]), row(p["beta1"]), row(p["g2"]), row(p["beta2"]),
         row(p["bd1"]), row(p["bd2"]), row(p["bsk"])], axis=0)      # [10, W]

    half = E // 2
    freq = jnp.exp(jnp.arange(half, dtype=f32)
                   * -(math.log(10000.0) / float(half - 1)))        # [E//2]

    return {
        "freq": freq,
        "vecs": vecs,
        "w1": jnp.asarray(p["w1t"], f32).astype(bf16),               # [E, H]
        "w2": jnp.asarray(p["w2t"], f32).astype(bf16),               # [H, H]
        "wss": jnp.concatenate([p["wst"], p["wsht"]],
                               axis=1).astype(bf16),                 # [H, 2M]
        "wd1": jnp.asarray(p["wd1t"], f32).astype(bf16),             # [E, M]
        "wd2": jnp.asarray(p["wd2t"], f32).astype(bf16),             # [M, M]
        "wsk": jnp.asarray(p["wskt"], f32).astype(bf16),             # [E, M]
    }


# ------------------------------------------------------------- fused kernel
def _make_kernel(E, M, H):
    f32, bf16 = jnp.float32, jnp.bfloat16

    def mm(a, w):
        # MXU: bf16 operands (weights already bf16), f32 accumulation.
        return jnp.dot(a.astype(bf16), w, preferred_element_type=f32)

    def kernel(nemb_ref, x_ref, vecs_ref,
               w1_ref, w2_ref, wss_ref, wd1_ref, wd2_ref, wsk_ref,
               o_ref):
        vecs = vecs_ref[...]                       # [10, W] f32, one DMA
        b1 = vecs[0:1, :H]
        b2 = vecs[1:2, :H]
        bss = vecs[2:3, :2 * M]
        g1 = vecs[3:4, :E]
        be1 = vecs[4:5, :E]
        g2 = vecs[5:6, :M]
        be2 = vecs[6:7, :M]
        bd1 = vecs[7:8, :M]
        bd2 = vecs[8:9, :M]
        bsk = vecs[9:10, :M]

        # ---- DenseFiLM for this batch (single-row MLP, essentially free) ---
        h = mm(nemb_ref[...], w1_ref[...]) + b1        # [1, H]
        h = h * jax.nn.sigmoid(h)                      # SiLU (f32)
        h = mm(h, w2_ref[...]) + b2                    # [1, H]
        ss = mm(h, wss_ref[...]) + bss                 # [1, 2M] scale|shift
        scale = ss[:, :M]                              # [1, M]
        shift = ss[:, M:]                              # [1, M]

        # ---- DenseResBlock on this row block (all f32 except MXU) ----------
        x = x_ref[...]                                 # [rb, E] f32

        def ln(v, g, b):
            mu = jnp.mean(v, axis=-1, keepdims=True)
            d = v - mu
            var = jnp.mean(d * d, axis=-1, keepdims=True)
            return d * jax.lax.rsqrt(var + LN_EPS) * g + b

        def silu(v):
            return v * jax.nn.sigmoid(v)

        y = ln(x, g1, be1)
        y = ln(y, g1, be1)                 # ln1 applied twice (reference quirk)
        y = silu(y * scale + shift)        # FA1 + swish1
        y = mm(y, wd1_ref[...]) + bd1      # dense1
        y = ln(y, g2, be2)                 # ln2
        y = ln(y, g1, be1)                 # ln1 again (reference quirk)
        y = silu(y * scale + shift)        # FA2 + swish2
        y = mm(y, wd2_ref[...]) + bd2      # dense2
        o_ref[...] = y + mm(x, wsk_ref[...]) + bsk

    return kernel


# ------------------------------------------------------------------ wrapper
def dense_encoder_out(x, t, prep):
    B, L, E = x.shape
    H = prep["w1"].shape[1]
    M = prep["wd1"].shape[1]
    assert prep["w1"].shape[0] == E
    assert E == M, "DenseEncoderOut only type-checks when n_embd == mlp_dims"
    assert E % 2 == 0 and E // 2 > 1, "noise embedding needs even E, E//2 > 1"

    # Sinusoidal noise embedding: O(B*E) scalar glue, precision-sensitive
    # (sin/cos of NOISE_SCALE-sized args) -> tiny XLA prologue.
    noise = t.reshape(B).astype(jnp.float32)
    exps = NOISE_SCALE * noise[:, None] * prep["freq"][None, :]
    nemb = jnp.concatenate([jnp.sin(exps), jnp.cos(exps)], axis=-1)   # [B, E]
    nemb = nemb[:, None, :]                                           # [B,1,E]

    # Row-blocked grid over (batch, seq-block); both axes 'parallel'.
    rb = _round_up(L, 8) if L <= 256 else 256
    Lp = _round_up(L, rb)
    xf = x.astype(jnp.float32)
    if Lp != L:
        xf = jnp.pad(xf, ((0, 0), (0, Lp - L), (0, 0)))

    vecs = prep["vecs"]
    w1, w2, wss = prep["w1"], prep["w2"], prep["wss"]
    wd1, wd2, wsk = prep["wd1"], prep["wd2"], prep["wsk"]

    def wspec(a):
        nd = a.ndim
        return pl.BlockSpec(a.shape, lambda b, r, _nd=nd: (0,) * _nd)

    grid = (B, Lp // rb)
    steps = B * (Lp // rb)

    # Advisory cost hint so XLA can overlap the prologue / output slice.
    flops = int(2 * B * Lp * (2 * E * M + M * M)
                + 2 * steps * (E * H + H * H + 2 * H * M))
    transcend = int(steps * (H + 2 * rb * M + 4 * rb))
    weight_bytes = 2 * (w1.size + w2.size + wss.size
                        + wd1.size + wd2.size + wsk.size)
    bytes_accessed = int(4 * B * Lp * (E + M) + 4 * B * E
                         + 4 * vecs.size + weight_bytes)

    # Explicit VMEM budget ((8,128)/(16,128)-tile padded, with headroom).
    def tile_bytes(shape, dtype):
        it = jnp.dtype(dtype).itemsize
        sub = 8 * max(1, 4 // it)
        r = shape[-2] if len(shape) > 1 else 1
        c = shape[-1]
        return _round_up(r, sub) * _round_up(c, 128) * it

    resident = sum(tile_bytes(a.shape, a.dtype)
                   for a in (vecs, w1, w2, wss, wd1, wd2, wsk))
    streamed = 2 * (tile_bytes((rb, E), jnp.float32)
                    + tile_bytes((rb, M), jnp.float32)
                    + tile_bytes((1, E), jnp.float32))
    vmem_limit = int(min(64 << 20, max(8 << 20, 4 * (resident + streamed))))

    out = pl.pallas_call(
        _make_kernel(E, M, H),
        out_shape=jax.ShapeDtypeStruct((B, Lp, M), jnp.float32),
        grid=grid,
        in_specs=[
            pl.BlockSpec((None, 1, E), lambda b, r: (b, 0, 0)),    # noise emb
            pl.BlockSpec((None, rb, E), lambda b, r: (b, r, 0)),   # x rows
            wspec(vecs),                                           # packed vecs
            wspec(w1), wspec(w2), wspec(wss),
            wspec(wd1), wspec(wd2), wspec(wsk),
        ],
        out_specs=pl.BlockSpec((None, rb, M), lambda b, r: (b, r, 0)),
        compiler_params=pltpu.CompilerParams(
            dimension_semantics=("parallel", "parallel"),
            vmem_limit_bytes=vmem_limit),
        cost_estimate=pl.CostEstimate(
            flops=flops, transcendentals=transcend,
            bytes_accessed=bytes_accessed),
    )(nemb, xf, vecs, w1, w2, wss, wd1, wd2, wsk)

    return out[:, :L, :]


# ---------------------------------------------------------- pure-JAX reference
def dense_encoder_out_ref(x, t, p):
    B, L, E = x.shape
    noise = t.reshape(B).astype(jnp.float32)
    half = E // 2
    emb = jnp.exp(jnp.arange(half, dtype=jnp.float32)
                  * -(math.log(10000.0) / float(half - 1)))
    ex = NOISE_SCALE * noise[:, None] * emb[None, :]
    nemb = jnp.concatenate([jnp.sin(ex), jnp.cos(ex)], axis=-1)

    def silu(v):
        return v * jax.nn.sigmoid(v)

    def ln(v, g, b):
        mu = v.mean(-1, keepdims=True)
        var = ((v - mu) ** 2).mean(-1, keepdims=True)
        return (v - mu) * jax.lax.rsqrt(var + LN_EPS) * g + b

    h = silu(nemb @ p["w1t"] + p["b1"])
    h = h @ p["w2t"] + p["b2"]
    scale = (h @ p["wst"] + p["bs"])[:, None, :]
    shift = (h @ p["wsht"] + p["bsh"])[:, None, :]

    inp = x
    y = ln(x, p["g1"], p["beta1"])
    y = ln(y, p["g1"], p["beta1"])
    y = silu(y * scale + shift)
    y = y @ p["wd1t"] + p["bd1"]
    y = ln(y, p["g2"], p["beta2"])
    y = ln(y, p["g1"], p["beta1"])
    y = silu(y * scale + shift)
    y = y @ p["wd2t"] + p["bd2"]
    return y + (inp @ p["wskt"] + p["bsk"])


# ------------------------------------------------------------------ params
def init_params(key, n_embd, mlp_dims):
    E, M, H = n_embd, mlp_dims, 4 * n_embd
    s = 0.1
    ks = jax.random.split(key, 18)
    f32 = jnp.float32
    nrm = lambda k, shp: s * jax.random.normal(k, shp, f32)
    return {
        # DenseFiLM
        "w1t": nrm(ks[0], (E, H)), "b1": nrm(ks[1], (1, H)),
        "w2t": nrm(ks[2], (H, H)), "b2": nrm(ks[3], (1, H)),
        "wst": nrm(ks[4], (H, M)), "bs": nrm(ks[5], (1, M)),
        "wsht": nrm(ks[6], (H, M)), "bsh": nrm(ks[7], (1, M)),
        # DenseResBlock
        "g1": 1.0 + nrm(ks[8], (1, E)), "beta1": nrm(ks[9], (1, E)),
        "g2": 1.0 + nrm(ks[10], (1, M)), "beta2": nrm(ks[11], (1, M)),
        "wd1t": nrm(ks[12], (E, M)), "bd1": nrm(ks[13], (1, M)),
        "wd2t": nrm(ks[14], (M, M)), "bd2": nrm(ks[15], (1, M)),
        "wskt": nrm(ks[16], (E, M)), "bsk": nrm(ks[17], (1, M)),
    }


if __name__ == "__main__":
    B, L, n_embd, mlp_dims = 2, 8, 32, 32   # module only type-checks if E == M
    key = jax.random.PRNGKey(0)
    kx, kt, kp = jax.random.split(key, 3)

    x = jax.random.normal(kx, (B, L, n_embd), jnp.float32)
    t = jax.random.uniform(kt, (B, 1, 1), jnp.float32)
    params = init_params(kp, n_embd, mlp_dims)

    # One-time (hoisted) weight preparation -- not part of the per-call path.
    prep = jax.tree_util.tree_map(jnp.asarray, prepare_params(params))
    prep = jax.block_until_ready(prep)

    fwd = jax.jit(dense_encoder_out)
    out = jax.block_until_ready(fwd(x, t, prep))

    ref = dense_encoder_out_ref(x, t, params)
    assert out.shape == (B, L, mlp_dims)
    assert bool(jnp.all(jnp.isfinite(out)))
    assert bool(jnp.allclose(out, ref, rtol=5e-2, atol=5e-2))

    print("KERNEL_OK")
</pallas_src>

<mosaic_0001>
module attributes {stable_mosaic.version = 11 : i64} {
  func.func @kernel(%arg0: i32, %arg1: i32, %arg2: memref<1x1x32xf32, #tpu.memory_space<vmem>>, %arg3: memref<1x8x32xf32, #tpu.memory_space<vmem>>, %arg4: memref<10x128xf32, #tpu.memory_space<vmem>>, %arg5: memref<32x128xbf16, #tpu.memory_space<vmem>>, %arg6: memref<128x128xbf16, #tpu.memory_space<vmem>>, %arg7: memref<128x64xbf16, #tpu.memory_space<vmem>>, %arg8: memref<32x32xbf16, #tpu.memory_space<vmem>>, %arg9: memref<32x32xbf16, #tpu.memory_space<vmem>>, %arg10: memref<32x32xbf16, #tpu.memory_space<vmem>>, %arg11: memref<1x8x32xf32, #tpu.memory_space<vmem>>) attributes {dimension_semantics = [#tpu.dimension_semantics<parallel>, #tpu.dimension_semantics<parallel>], iteration_bounds = array<i64: 2, 1>, scalar_prefetch = 0 : i64, scratch_operands = 0 : i64, tpu.core_type = #tpu.core_type<tc>, window_params = [{transform_indices = @transform_0, window_bounds = array<i64: 1, 1, 32>}, {transform_indices = @transform_1, window_bounds = array<i64: 1, 8, 32>}, {pipeline_mode = #tpu.pipeline_mode<synchronous>, transform_indices = @transform_2, window_bounds = array<i64: 10, 128>}, {pipeline_mode = #tpu.pipeline_mode<synchronous>, transform_indices = @transform_3, window_bounds = array<i64: 32, 128>}, {pipeline_mode = #tpu.pipeline_mode<synchronous>, transform_indices = @transform_4, window_bounds = array<i64: 128, 128>}, {pipeline_mode = #tpu.pipeline_mode<synchronous>, transform_indices = @transform_5, window_bounds = array<i64: 128, 64>}, {pipeline_mode = #tpu.pipeline_mode<synchronous>, transform_indices = @transform_6, window_bounds = array<i64: 32, 32>}, {pipeline_mode = #tpu.pipeline_mode<synchronous>, transform_indices = @transform_7, window_bounds = array<i64: 32, 32>}, {pipeline_mode = #tpu.pipeline_mode<synchronous>, transform_indices = @transform_8, window_bounds = array<i64: 32, 32>}, {transform_indices = @transform_9, window_bounds = array<i64: 1, 8, 32>}]} {
    %c0 = arith.constant 0 : index
    %c0_0 = arith.constant 0 : index
    %0 = vector.load %arg4[%c0, %c0_0] : memref<10x128xf32, #tpu.memory_space<vmem>>, vector<10x128xf32>
    %1 = vector.extract_strided_slice %0 {offsets = [0, 0], sizes = [1, 128], strides = [1, 1]} : vector<10x128xf32> to vector<1x128xf32>
    %2 = vector.extract_strided_slice %0 {offsets = [1, 0], sizes = [1, 128], strides = [1, 1]} : vector<10x128xf32> to vector<1x128xf32>
    %3 = vector.extract_strided_slice %0 {offsets = [2, 0], sizes = [1, 64], strides = [1, 1]} : vector<10x128xf32> to vector<1x64xf32>
    %4 = vector.extract_strided_slice %0 {offsets = [3, 0], sizes = [1, 32], strides = [1, 1]} : vector<10x128xf32> to vector<1x32xf32>
    %5 = vector.extract_strided_slice %0 {offsets = [4, 0], sizes = [1, 32], strides = [1, 1]} : vector<10x128xf32> to vector<1x32xf32>
    %6 = vector.extract_strided_slice %0 {offsets = [5, 0], sizes = [1, 32], strides = [1, 1]} : vector<10x128xf32> to vector<1x32xf32>
    %7 = vector.extract_strided_slice %0 {offsets = [6, 0], sizes = [1, 32], strides = [1, 1]} : vector<10x128xf32> to vector<1x32xf32>
    %8 = vector.extract_strided_slice %0 {offsets = [7, 0], sizes = [1, 32], strides = [1, 1]} : vector<10x128xf32> to vector<1x32xf32>
    %9 = vector.extract_strided_slice %0 {offsets = [8, 0], sizes = [1, 32], strides = [1, 1]} : vector<10x128xf32> to vector<1x32xf32>
    %10 = vector.extract_strided_slice %0 {offsets = [9, 0], sizes = [1, 32], strides = [1, 1]} : vector<10x128xf32> to vector<1x32xf32>
    %c0_1 = arith.constant 0 : index
    %c0_2 = arith.constant 0 : index
    %c0_3 = arith.constant 0 : index
    %11 = vector.load %arg2[%c0_1, %c0_2, %c0_3] : memref<1x1x32xf32, #tpu.memory_space<vmem>>, vector<1x1x32xf32>
    %12 = vector.shape_cast %11 : vector<1x1x32xf32> to vector<1x32xf32>
    %c0_4 = arith.constant 0 : index
    %c0_5 = arith.constant 0 : index
    %13 = vector.load %arg5[%c0_4, %c0_5] : memref<32x128xbf16, #tpu.memory_space<vmem>>, vector<32x128xbf16>
    %14 = arith.truncf %12 : vector<1x32xf32> to vector<1x32xbf16>
    %cst = arith.constant dense<0.000000e+00> : vector<1x128xf32>
    %15 = tpu.matmul %14, %13, %cst {dimension_numbers = #tpu.dot_dimension_numbers<[1], [0], [0], [1], [0, 0, 1, 1], [], []>} : vector<1x32xbf16>, vector<32x128xbf16>, vector<1x128xf32> -> vector<1x128xf32>
    %16 = arith.addf %15, %1 : vector<1x128xf32>
    %17 = arith.negf %16 : vector<1x128xf32>
    %18 = math.exp %17 : vector<1x128xf32>
    %cst_6 = arith.constant 1.000000e+00 : f32
    %19 = vector.broadcast %cst_6 : f32 to vector<1x128xf32>
    %20 = arith.addf %19, %18 : vector<1x128xf32>
    %21 = arith.divf %19, %20 : vector<1x128xf32>
    %22 = arith.mulf %16, %21 : vector<1x128xf32>
    %c0_7 = arith.constant 0 : index
    %c0_8 = arith.constant 0 : index
    %23 = vector.load %arg6[%c0_7, %c0_8] : memref<128x128xbf16, #tpu.memory_space<vmem>>, vector<128x128xbf16>
    %24 = arith.truncf %22 : vector<1x128xf32> to vector<1x128xbf16>
    %cst_9 = arith.constant dense<0.000000e+00> : vector<1x128xf32>
    %25 = tpu.matmul %24, %23, %cst_9 {dimension_numbers = #tpu.dot_dimension_numbers<[1], [0], [0], [1], [0, 0, 1, 1], [], []>} : vector<1x128xbf16>, vector<128x128xbf16>, vector<1x128xf32> -> vector<1x128xf32>
    %26 = arith.addf %25, %2 : vector<1x128xf32>
    %c0_10 = arith.constant 0 : index
    %c0_11 = arith.constant 0 : index
    %27 = vector.load %arg7[%c0_10, %c0_11] : memref<128x64xbf16, #tpu.memory_space<vmem>>, vector<128x64xbf16>
    %28 = arith.truncf %26 : vector<1x128xf32> to vector<1x128xbf16>
    %cst_12 = arith.constant dense<0.000000e+00> : vector<1x64xf32>
    %29 = tpu.matmul %28, %27, %cst_12 {dimension_numbers = #tpu.dot_dimension_numbers<[1], [0], [0], [1], [0, 0, 1, 1], [], []>} : vector<1x128xbf16>, vector<128x64xbf16>, vector<1x64xf32> -> vector<1x64xf32>
    %30 = arith.addf %29, %3 : vector<1x64xf32>
    %31 = vector.extract_strided_slice %30 {offsets = [0, 0], sizes = [1, 32], strides = [1, 1]} : vector<1x64xf32> to vector<1x32xf32>
    %32 = vector.extract_strided_slice %30 {offsets = [0, 32], sizes = [1, 32], strides = [1, 1]} : vector<1x64xf32> to vector<1x32xf32>
    %c0_13 = arith.constant 0 : index
    %c0_14 = arith.constant 0 : index
    %c0_15 = arith.constant 0 : index
    %33 = vector.load %arg3[%c0_13, %c0_14, %c0_15] : memref<1x8x32xf32, #tpu.memory_space<vmem>>, vector<1x8x32xf32>
    %34 = vector.shape_cast %33 : vector<1x8x32xf32> to vector<8x32xf32>
    %cst_16 = arith.constant dense<0.000000e+00> : vector<8xf32>
    %35 = vector.multi_reduction <add>, %34, %cst_16 [1] : vector<8x32xf32> to vector<8xf32>
    %36 = vector.shape_cast %35 : vector<8xf32> to vector<8x1xf32>
    %cst_17 = arith.constant 3.200000e+01 : f32
    %37 = vector.broadcast %cst_17 : f32 to vector<8x1xf32>
    %38 = arith.divf %36, %37 : vector<8x1xf32>
    %39 = vector.broadcast %38 : vector<8x1xf32> to vector<8x32xf32>
    %40 = arith.subf %34, %39 : vector<8x32xf32>
    %41 = arith.mulf %40, %40 : vector<8x32xf32>
    %cst_18 = arith.constant dense<0.000000e+00> : vector<8xf32>
    %42 = vector.multi_reduction <add>, %41, %cst_18 [1] : vector<8x32xf32> to vector<8xf32>
    %43 = vector.shape_cast %42 : vector<8xf32> to vector<8x1xf32>
    %cst_19 = arith.constant 3.200000e+01 : f32
    %44 = vector.broadcast %cst_19 : f32 to vector<8x1xf32>
    %45 = arith.divf %43, %44 : vector<8x1xf32>
    %cst_20 = arith.constant 9.99999974E-6 : f32
    %46 = vector.broadcast %cst_20 : f32 to vector<8x1xf32>
    %47 = arith.addf %45, %46 : vector<8x1xf32>
    %48 = math.rsqrt %47 : vector<8x1xf32>
    %49 = vector.broadcast %48 : vector<8x1xf32> to vector<8x32xf32>
    %50 = arith.mulf %40, %49 : vector<8x32xf32>
    %51 = vector.broadcast %4 : vector<1x32xf32> to vector<8x32xf32>
    %52 = arith.mulf %50, %51 : vector<8x32xf32>
    %53 = vector.broadcast %5 : vector<1x32xf32> to vector<8x32xf32>
    %54 = arith.addf %52, %53 : vector<8x32xf32>
    %cst_21 = arith.constant dense<0.000000e+00> : vector<8xf32>
    %55 = vector.multi_reduction <add>, %54, %cst_21 [1] : vector<8x32xf32> to vector<8xf32>
    %56 = vector.shape_cast %55 : vector<8xf32> to vector<8x1xf32>
    %cst_22 = arith.constant 3.200000e+01 : f32
    %57 = vector.broadcast %cst_22 : f32 to vector<8x1xf32>
    %58 = arith.divf %56, %57 : vector<8x1xf32>
    %59 = vector.broadcast %58 : vector<8x1xf32> to vector<8x32xf32>
    %60 = arith.subf %54, %59 : vector<8x32xf32>
    %61 = arith.mulf %60, %60 : vector<8x32xf32>
    %cst_23 = arith.constant dense<0.000000e+00> : vector<8xf32>
    %62 = vector.multi_reduction <add>, %61, %cst_23 [1] : vector<8x32xf32> to vector<8xf32>
    %63 = vector.shape_cast %62 : vector<8xf32> to vector<8x1xf32>
    %cst_24 = arith.constant 3.200000e+01 : f32
    %64 = vector.broadcast %cst_24 : f32 to vector<8x1xf32>
    %65 = arith.divf %63, %64 : vector<8x1xf32>
    %cst_25 = arith.constant 9.99999974E-6 : f32
    %66 = vector.broadcast %cst_25 : f32 to vector<8x1xf32>
    %67 = arith.addf %65, %66 : vector<8x1xf32>
    %68 = math.rsqrt %67 : vector<8x1xf32>
    %69 = vector.broadcast %68 : vector<8x1xf32> to vector<8x32xf32>
    %70 = arith.mulf %60, %69 : vector<8x32xf32>
    %71 = vector.broadcast %4 : vector<1x32xf32> to vector<8x32xf32>
    %72 = arith.mulf %70, %71 : vector<8x32xf32>
    %73 = vector.broadcast %5 : vector<1x32xf32> to vector<8x32xf32>
    %74 = arith.addf %72, %73 : vector<8x32xf32>
    %75 = vector.broadcast %31 : vector<1x32xf32> to vector<8x32xf32>
    %76 = arith.mulf %74, %75 : vector<8x32xf32>
    %77 = vector.broadcast %32 : vector<1x32xf32> to vector<8x32xf32>
    %78 = arith.addf %76, %77 : vector<8x32xf32>
    %79 = arith.negf %78 : vector<8x32xf32>
    %80 = math.exp %79 : vector<8x32xf32>
    %cst_26 = arith.constant 1.000000e+00 : f32
    %81 = vector.broadcast %cst_26 : f32 to vector<8x32xf32>
    %82 = arith.addf %81, %80 : vector<8x32xf32>
    %83 = arith.divf %81, %82 : vector<8x32xf32>
    %84 = arith.mulf %78, %83 : vector<8x32xf32>
    %c0_27 = arith.constant 0 : index
    %c0_28 = arith.constant 0 : index
    %85 = vector.load %arg8[%c0_27, %c0_28] : memref<32x32xbf16, #tpu.memory_space<vmem>>, vector<32x32xbf16>
    %86 = arith.truncf %84 : vector<8x32xf32> to vector<8x32xbf16>
    %cst_29 = arith.constant dense<0.000000e+00> : vector<8x32xf32>
    %87 = tpu.matmul %86, %85, %cst_29 {dimension_numbers = #tpu.dot_dimension_numbers<[1], [0], [0], [1], [0, 0, 1, 1], [], []>} : vector<8x32xbf16>, vector<32x32xbf16>, vector<8x32xf32> -> vector<8x32xf32>
    %88 = vector.broadcast %8 : vector<1x32xf32> to vector<8x32xf32>
    %89 = arith.addf %87, %88 : vector<8x32xf32>
    %cst_30 = arith.constant dense<0.000000e+00> : vector<8xf32>
    %90 = vector.multi_reduction <add>, %89, %cst_30 [1] : vector<8x32xf32> to vector<8xf32>
    %91 = vector.shape_cast %90 : vector<8xf32> to vector<8x1xf32>
    %cst_31 = arith.constant 3.200000e+01 : f32
    %92 = vector.broadcast %cst_31 : f32 to vector<8x1xf32>
    %93 = arith.divf %91, %92 : vector<8x1xf32>
    %94 = vector.broadcast %93 : vector<8x1xf32> to vector<8x32xf32>
    %95 = arith.subf %89, %94 : vector<8x32xf32>
    %96 = arith.mulf %95, %95 : vector<8x32xf32>
    %cst_32 = arith.constant dense<0.000000e+00> : vector<8xf32>
    %97 = vector.multi_reduction <add>, %96, %cst_32 [1] : vector<8x32xf32> to vector<8xf32>
    %98 = vector.shape_cast %97 : vector<8xf32> to vector<8x1xf32>
    %cst_33 = arith.constant 3.200000e+01 : f32
    %99 = vector.broadcast %cst_33 : f32 to vector<8x1xf32>
    %100 = arith.divf %98, %99 : vector<8x1xf32>
    %cst_34 = arith.constant 9.99999974E-6 : f32
    %101 = vector.broadcast %cst_34 : f32 to vector<8x1xf32>
    %102 = arith.addf %100, %101 : vector<8x1xf32>
    %103 = math.rsqrt %102 : vector<8x1xf32>
    %104 = vector.broadcast %103 : vector<8x1xf32> to vector<8x32xf32>
    %105 = arith.mulf %95, %104 : vector<8x32xf32>
    %106 = vector.broadcast %6 : vector<1x32xf32> to vector<8x32xf32>
    %107 = arith.mulf %105, %106 : vector<8x32xf32>
    %108 = vector.broadcast %7 : vector<1x32xf32> to vector<8x32xf32>
    %109 = arith.addf %107, %108 : vector<8x32xf32>
    %cst_35 = arith.constant dense<0.000000e+00> : vector<8xf32>
    %110 = vector.multi_reduction <add>, %109, %cst_35 [1] : vector<8x32xf32> to vector<8xf32>
    %111 = vector.shape_cast %110 : vector<8xf32> to vector<8x1xf32>
    %cst_36 = arith.constant 3.200000e+01 : f32
    %112 = vector.broadcast %cst_36 : f32 to vector<8x1xf32>
    %113 = arith.divf %111, %112 : vector<8x1xf32>
    %114 = vector.broadcast %113 : vector<8x1xf32> to vector<8x32xf32>
    %115 = arith.subf %109, %114 : vector<8x32xf32>
    %116 = arith.mulf %115, %115 : vector<8x32xf32>
    %cst_37 = arith.constant dense<0.000000e+00> : vector<8xf32>
    %117 = vector.multi_reduction <add>, %116, %cst_37 [1] : vector<8x32xf32> to vector<8xf32>
    %118 = vector.shape_cast %117 : vector<8xf32> to vector<8x1xf32>
    %cst_38 = arith.constant 3.200000e+01 : f32
    %119 = vector.broadcast %cst_38 : f32 to vector<8x1xf32>
    %120 = arith.divf %118, %119 : vector<8x1xf32>
    %cst_39 = arith.constant 9.99999974E-6 : f32
    %121 = vector.broadcast %cst_39 : f32 to vector<8x1xf32>
    %122 = arith.addf %120, %121 : vector<8x1xf32>
    %123 = math.rsqrt %122 : vector<8x1xf32>
    %124 = vector.broadcast %123 : vector<8x1xf32> to vector<8x32xf32>
    %125 = arith.mulf %115, %124 : vector<8x32xf32>
    %126 = vector.broadcast %4 : vector<1x32xf32> to vector<8x32xf32>
    %127 = arith.mulf %125, %126 : vector<8x32xf32>
    %128 = vector.broadcast %5 : vector<1x32xf32> to vector<8x32xf32>
    %129 = arith.addf %127, %128 : vector<8x32xf32>
    %130 = vector.broadcast %31 : vector<1x32xf32> to vector<8x32xf32>
    %131 = arith.mulf %129, %130 : vector<8x32xf32>
    %132 = vector.broadcast %32 : vector<1x32xf32> to vector<8x32xf32>
    %133 = arith.addf %131, %132 : vector<8x32xf32>
    %134 = arith.negf %133 : vector<8x32xf32>
    %135 = math.exp %134 : vector<8x32xf32>
    %cst_40 = arith.constant 1.000000e+00 : f32
    %136 = vector.broadcast %cst_40 : f32 to vector<8x32xf32>
    %137 = arith.addf %136, %135 : vector<8x32xf32>
    %138 = arith.divf %136, %137 : vector<8x32xf32>
    %139 = arith.mulf %133, %138 : vector<8x32xf32>
    %c0_41 = arith.constant 0 : index
    %c0_42 = arith.constant 0 : index
    %140 = vector.load %arg9[%c0_41, %c0_42] : memref<32x32xbf16, #tpu.memory_space<vmem>>, vector<32x32xbf16>
    %141 = arith.truncf %139 : vector<8x32xf32> to vector<8x32xbf16>
    %cst_43 = arith.constant dense<0.000000e+00> : vector<8x32xf32>
    %142 = tpu.matmul %141, %140, %cst_43 {dimension_numbers = #tpu.dot_dimension_numbers<[1], [0], [0], [1], [0, 0, 1, 1], [], []>} : vector<8x32xbf16>, vector<32x32xbf16>, vector<8x32xf32> -> vector<8x32xf32>
    %143 = vector.broadcast %9 : vector<1x32xf32> to vector<8x32xf32>
    %144 = arith.addf %142, %143 : vector<8x32xf32>
    %c0_44 = arith.constant 0 : index
    %c0_45 = arith.constant 0 : index
    %145 = vector.load %arg10[%c0_44, %c0_45] : memref<32x32xbf16, #tpu.memory_space<vmem>>, vector<32x32xbf16>
    %146 = arith.truncf %34 : vector<8x32xf32> to vector<8x32xbf16>
    %cst_46 = arith.constant dense<0.000000e+00> : vector<8x32xf32>
    %147 = tpu.matmul %146, %145, %cst_46 {dimension_numbers = #tpu.dot_dimension_numbers<[1], [0], [0], [1], [0, 0, 1, 1], [], []>} : vector<8x32xbf16>, vector<32x32xbf16>, vector<8x32xf32> -> vector<8x32xf32>
    %148 = arith.addf %144, %147 : vector<8x32xf32>
    %149 = vector.broadcast %10 : vector<1x32xf32> to vector<8x32xf32>
    %150 = arith.addf %148, %149 : vector<8x32xf32>
    %c0_47 = arith.constant 0 : index
    %c0_48 = arith.constant 0 : index
    %c0_49 = arith.constant 0 : index
    %151 = vector.load %arg11[%c0_47, %c0_48, %c0_49] : memref<1x8x32xf32, #tpu.memory_space<vmem>>, vector<1x8x32xf32>
    %152 = vector.shape_cast %151 : vector<1x8x32xf32> to vector<8x32xf32>
    %153 = vector.shape_cast %150 : vector<8x32xf32> to vector<1x8x32xf32>
    tpu.vector_store %arg11[%c0_47, %c0_48, %c0_49], %153 {strides = array<i32>} : memref<1x8x32xf32, #tpu.memory_space<vmem>>, vector<1x8x32xf32>,
    return
  }
  func.func @transform_0(%arg0: i32, %arg1: i32) -> (i32, i32, i32) {
    %c0_i32 = arith.constant 0 : i32
    %c0_i32_0 = arith.constant 0 : i32
    %c0_i32_1 = arith.constant 0 : i32
    return %arg0, %c0_i32, %c0_i32_0 : i32, i32, i32
  }
  func.func @transform_1(%arg0: i32, %arg1: i32) -> (i32, i32, i32) {
    %c0_i32 = arith.constant 0 : i32
    %c0_i32_0 = arith.constant 0 : i32
    return %arg0, %arg1, %c0_i32 : i32, i32, i32
  }
  func.func @transform_2(%arg0: i32, %arg1: i32) -> (i32, i32) {
    %c0_i32 = arith.constant 0 : i32
    %c0_i32_0 = arith.constant 0 : i32
    %c0_i32_1 = arith.constant 0 : i32
    return %c0_i32, %c0_i32_0 : i32, i32
  }
  func.func @transform_3(%arg0: i32, %arg1: i32) -> (i32, i32) {
    %c0_i32 = arith.constant 0 : i32
    %c0_i32_0 = arith.constant 0 : i32
    %c0_i32_1 = arith.constant 0 : i32
    return %c0_i32, %c0_i32_0 : i32, i32
  }
  func.func @transform_4(%arg0: i32, %arg1: i32) -> (i32, i32) {
    %c0_i32 = arith.constant 0 : i32
    %c0_i32_0 = arith.constant 0 : i32
    %c0_i32_1 = arith.constant 0 : i32
    return %c0_i32, %c0_i32_0 : i32, i32
  }
  func.func @transform_5(%arg0: i32, %arg1: i32) -> (i32, i32) {
    %c0_i32 = arith.constant 0 : i32
    %c0_i32_0 = arith.constant 0 : i32
    %c0_i32_1 = arith.constant 0 : i32
    return %c0_i32, %c0_i32_0 : i32, i32
  }
  func.func @transform_6(%arg0: i32, %arg1: i32) -> (i32, i32) {
    %c0_i32 = arith.constant 0 : i32
    %c0_i32_0 = arith.constant 0 : i32
    %c0_i32_1 = arith.constant 0 : i32
    return %c0_i32, %c0_i32_0 : i32, i32
  }
  func.func @transform_7(%arg0: i32, %arg1: i32) -> (i32, i32) {
    %c0_i32 = arith.constant 0 : i32
    %c0_i32_0 = arith.constant 0 : i32
    %c0_i32_1 = arith.constant 0 : i32
    return %c0_i32, %c0_i32_0 : i32, i32
  }
  func.func @transform_8(%arg0: i32, %arg1: i32) -> (i32, i32) {
    %c0_i32 = arith.constant 0 : i32
    %c0_i32_0 = arith.constant 0 : i32
    %c0_i32_1 = arith.constant 0 : i32
    return %c0_i32, %c0_i32_0 : i32, i32
  }
  func.func @transform_9(%arg0: i32, %arg1: i32) -> (i32, i32, i32) {
    %c0_i32 = arith.constant 0 : i32
    %c0_i32_0 = arith.constant 0 : i32
    return %arg0, %arg1, %c0_i32 : i32, i32, i32
  }
}

</mosaic_0001>

<bundles_post_ra>
// kernel: dense_encoder_out.1
= control target key start
LH: loop header
LB: loop body
LE: loop exit
PB: predicated region body
PF: predicated region fallthrough
CT: control target
= control target key end

     0   :  { %s2034_s0 = inlined_call_operand.vmem [shape: f32[2,1,32], index: 0, kind: input, shape index: {}]   ;;  %s2035_s1 = inlined_call_operand.vmem [shape: f32[2,8,32], index: 1, kind: input, shape index: {}]   ;;  %s2036_s2 = inlined_call_operand.vmem [shape: f32[10,128], index: 2, kind: input, shape index: {}]   ;;  %s2037_s3 = inlined_call_operand.hbm [shape: bf16[32,128], index: 3, kind: input, shape index: {}]   ;;  %s2038_s4 = inlined_call_operand.vmem [shape: bf16[128,128], index: 4, kind: input, shape index: {}]   ;;  %s2039_s5 = inlined_call_operand.vmem [shape: bf16[128,64], index: 5, kind: input, shape index: {}]   ;;  %s2040_s6 = inlined_call_operand.hbm [shape: bf16[32,32], index: 6, kind: input, shape index: {}]   ;;  %s2041_s7 = inlined_call_operand.hbm [shape: bf16[32,32], index: 7, kind: input, shape index: {}]   ;;  %s2042_s8 = inlined_call_operand.hbm [shape: bf16[32,32], index: 8, kind: input, shape index: {}]   ;;  %s2043_s9 = inlined_call_operand.hbm [shape: f32[2,8,32], index: 9, kind: output, shape index: {}]  }
   0x1   :  { %2046 = sst [smem:[#allocation17_spill]] %s2040_s6 }
   0x2   :  { %14 = vsyncpa [#allocation3], 0 }
   0x3   :  { %15 = vsyncpa [#allocation6], 0 }
   0x4   :  { %16 = vsyncpa [#allocation9], 0 }
   0x5   :  { %17 = vsyncpa [#allocation4], 0 }
   0x6   :  { %19 = vsyncpa [#allocation4 + $0x1], 0  ;;  %s1699_s30 = smov 0   ;;  %s1701_s10 = smov 0  }
   0x7   :  { %s1703_s11 = smov 0   ;;  %s1705_s12 = smov 0  }
   0x8   :  { %s1707_s13 = smov 0   ;;  %s1709_s14 = smov 0  }
   0x9 LB: > { %2047 = sst [smem:[#allocation15_spill]] %s1633_s13  ;;  %s1148_s15 = sadd.s32 4294967295, %s1637_s14   ;;  %s1637_s14 = sphi %s1709_s14, %s25_s14   ;;  %s1633_s13 = sphi %s1707_s13, %s2056_s13   ;;  %s1629_s12 = sphi %s1705_s12, %s2055_s12   ;;  %s1625_s11 = sphi %s1703_s11, %s2059_s11   ;;  %s1621_s10 = sphi %s1701_s10, %s2058_s10   ;;  %s1617_s30 = sphi %s1699_s30, %s2057_s30  }
   0xa   : > { %s1149_s16 = sadd.s32 4294967294, %s1637_s14   ;;  %s37_s17 = sadd.s32 1, %s1633_s13 }
   0xb   : > { %s247_s18 = sadd.s32 1, %s1625_s11  ;;  %p39_p0 = scmp.ge.s32.totalorder %s37_s17, 2 }
   0xc   : > { %p257_p1 = scmp.ne.s32.totalorder %s1625_s11, %s1621_s10  ;;  %p258_p2 = scmp.eq.s32.totalorder %s1148_s15, 1 }
   0xd   : > { %p263_p3 = scmp.ne.s32.totalorder %s1621_s10, %s1617_s30  ;;  %s2061_s17 = smov (%p39_p0, %s37_s17), 0 }
   0xe   : > { %2048 = sst [smem:[#allocation16_spill]] %s2061_s17  ;;  %p1739_p4 = por %p258_p2, %p257_p1 }
   0xf   : > { %p264_p5 = scmp.eq.s32.totalorder %s1149_s16, 1  ;;  %s242_s20 = ssub.s32 %s1633_s13, %s2061_s17 }
  0x10   : > { %p1150_p6 = scmp.ge.s32.totalorder %s1637_s14, 1  ;;  %p245_p7 = scmp.eq.s32.totalorder %s242_s20, 0 }
  0x11   : > { %p1746_p8 = por %p264_p5, %p263_p3  ;;  %p271_p9 = scmp.lt.s32.totalorder %s1637_s14, 3 }
  0x12   : > { %s1752_s22 = scalar_select %p245_p7, %s1625_s11, %s247_s18  }
  0x13   : > { %p1754_p10 = pnand %p1150_p6, %p271_p9  ;;  %p1758_p11 = scmp.eq.s32.totalorder %s1148_s15, 0 }
  0x14   : > { %s1639_s25 = smov [#allocation5]   ;;  %s1640_s28 = smov [#allocation2]  }
  0x15   : > { %p1318_p12 = pneg %p1754_p10  ;;  %s305_s26 = sshll.u32 %s1639_s25, 4  ;;  %s306_s26 = int_to_ptr.vmem [resolvable:$true] %s305_s26 }
  0x16   : > { %s286_s29 = sshll.u32 %s1640_s28, 4  ;;  %s1456_s15 = scalar_lea.vmem %s306_s26, 256  ;;  %s287_s29 = int_to_ptr.vmem [resolvable:$true] %s286_s29 }
  0x17   : > { %p1766_p13 = pnand %p1758_p11, %p1318_p12  ;;  %p1457_p1 = scmp.ne.s32.totalorder %s306_s26, %s1456_s15 }
  0x18   : > { %p1464_p5 = scmp.lt.s32.totalorder %s306_s26, %s306_s26  ;;  %p1465_p6 = scmp.lt.s32.totalorder %s1456_s15, %s1456_s15 }
  0x19   : > { %p1447_p0 = pneg %p1766_p13 }
  0x1a   : > { %p1466_p7 = por %p1465_p6, %p1464_p5 }
  0x1b   : > { %p1459_p2 = pnand %p1457_p1, %p1447_p0 }
  0x1d   : > { %p1460_p3 = pneg %p1459_p2 }
  0x1f   : > { %p1467_p9 = pnand %p1466_p7, %p1460_p3 }
  0x21   : > { %1470 = shalt.err (!%p1467_p9)
}
  0x22   : > { %s1641_s16 = smov 64   ;;  %s1642_s18 = smov 4  }
  0x23   : > { %s2054_s6 = sld [smem:[#allocation17_spill]]  ;;  %s1482_s28 = scalar_lea.vmem %s287_s29, 256 }
  0x24   : > { %p1483_p12 = scmp.ne.s32.totalorder %s287_s29, %s1482_s28  ;;  %p1490_p3 = scmp.lt.s32.totalorder %s287_s29, %s287_s29 }
  0x25   : > { %p1491_p5 = scmp.lt.s32.totalorder %s1482_s28, %s1482_s28 }
  0x26   : > { %p1485_p1 = pnand %p1483_p12, %p1447_p0 }
  0x27   : > { %p1492_p6 = por %p1491_p5, %p1490_p3 }
  0x28   : > { %p1486_p2 = pneg %p1485_p1 }
  0x29   : > { %1324 = dma.hbm_to_vmem [thread:$0]  (!%p1766_p13), %s2054_s6, 256, %s306_s26, [#allocation6], %s1641_s16, %s1641_s16, %s1642_s18  }
  0x2a   : > { %p1493_p7 = pnand %p1492_p6, %p1486_p2 }
  0x2c   : > { %1496 = shalt.err (!%p1493_p7)
}
  0x2d   : > { %1321 = dma.hbm_to_vmem [thread:$0]  (!%p1766_p13), %s2037_s3, 256, %s287_s29, [#allocation3], %s1641_s16, %s1641_s16, %s1642_s18  }
  0x2e   : > { %s1643_s26 = smov [#allocation7]   ;;  %s1644_s6 = smov [#allocation8]  }
  0x2f   : > { %s318_s25 = sshll.u32 %s1643_s26, 4  ;;  %s331_s17 = sshll.u32 %s1644_s6, 4  ;;  %s319_s25 = int_to_ptr.vmem [resolvable:$true] %s318_s25  ;;  %s332_s17 = int_to_ptr.vmem [resolvable:$true] %s331_s17 }
  0x30   : > { %s1508_s13 = scalar_lea.vmem %s319_s25, 256  ;;  %p1516_p2 = scmp.lt.s32.totalorder %s319_s25, %s319_s25 }
  0x31   : > { %p1509_p9 = scmp.ne.s32.totalorder %s319_s25, %s1508_s13  ;;  %p1517_p3 = scmp.lt.s32.totalorder %s1508_s13, %s1508_s13 }
  0x33   : > { %p1511_p12 = pnand %p1509_p9, %p1447_p0  ;;  %p1518_p5 = por %p1517_p3, %p1516_p2 }
  0x35   : > { %p1512_p1 = pneg %p1511_p12 }
  0x37   : > { %p1519_p6 = pnand %p1518_p5, %p1512_p1 }
  0x39   : > { %1522 = shalt.err (!%p1519_p6)
}
  0x3a   : > { %1327 = dma.hbm_to_vmem [thread:$0]  (!%p1766_p13), %s2041_s7, 256, %s319_s25, [#allocation6], %s1641_s16, %s1641_s16, %s1642_s18  }
  0x3b   : > { %s1534_s6 = scalar_lea.vmem %s332_s17, 256  ;;  %p1542_p2 = scmp.lt.s32.totalorder %s332_s17, %s332_s17 }
  0x3c   : > { %p1535_p7 = scmp.ne.s32.totalorder %s332_s17, %s1534_s6  ;;  %p1543_p1 = scmp.lt.s32.totalorder %s1534_s6, %s1534_s6 }
  0x3e   : > { %p1537_p9 = pnand %p1535_p7, %p1447_p0  ;;  %p1544_p3 = por %p1543_p1, %p1542_p2 }
  0x40   : > { %p1538_p12 = pneg %p1537_p9 }
  0x42   : > { %p1545_p5 = pnand %p1544_p3, %p1538_p12 }
  0x44   : > { %1548 = shalt.err (!%p1545_p5)
}
  0x45   : > { %1330 = dma.hbm_to_vmem [thread:$0]  (!%p1766_p13), %s2042_s8, 256, %s332_s17, [#allocation9], %s1641_s16, %s1641_s16, %s1642_s18  }
  0x46   : > { %363 = sbr.rel (%p1754_p10) target bundleno = 1931 (0x78b), region = 56 }
  0x4b   : > { %1600 = dma.done.wait (%p1758_p11), [#allocation3], 256  }
  0x4c   : > { %1602 = vsyncadd (%p1758_p11), [#allocation3], 4294967040 }
  0x4d   : > { %1604 = dma.done.wait (%p1758_p11), [#allocation6], 512  }
  0x4e   : > { %1606 = vsyncadd (%p1758_p11), [#allocation6], 4294966784 }
  0x4f   : > { %1608 = dma.done.wait (%p1758_p11), [#allocation9], 256  }
  0x50   : > { %1610 = vsyncadd (%p1758_p11), [#allocation9], 4294967040  ;;  %p416_p10 = scmp.lt.s32.totalorder %s1629_s12, 1  ;;  %v1645_v0 = vmov 0.0   ;;  %vm1646_vm0 = vmmov 0   ;;  %vm447_vm1 = vcmask 261120   ;;  %v728_v42 = vlaneseq }
  0x51   : > { %1228 = vmatprep.subr.bf16.mxu0 %v1645_v0  ;;  %1232 = vmatprep.mubr.msk.bf16.mxu0 %vm1646_vm0, %v1645_v0  ;;  %v1401_v3 = vld [vmem:[#allocation2 + $0x8] sm:$0xff]   ;;  %v1402_v4 = vld [vmem:[#allocation2] sm:$0xff]   ;;  %v1403_v7 = vld [vmem:[%s2038_s4 + $0x38] sm:$0xff]   ;;  %s1195_s18 = sshll.u32 %s1629_s12, 7 }
  0x52   : > { %s417_s17 = scalar_select %p416_p10, %s1629_s12, 1  ;;  %1236 = vmatprep.subr.bf16.mxu1 %v1645_v0  ;;  %1252 = vmatprep.mubr.msk.bf16.mxu1 %vm1646_vm0, %v1645_v0  ;;  %v1404_v8 = vld [vmem:[%s2038_s4 + $0x30] sm:$0xff]   ;;  %v1405_v9 = vld [vmem:[%s2038_s4 + $0x28] sm:$0xff]   ;;  %v1406_v10 = vld [vmem:[%s2038_s4 + $0x20] sm:$0xff]   ;;  %v1923_v43 = vshrl.u32 %v728_v42, 7 }
  0x53   : > { %1229 = vmatpush3.bf16.msra.mxu0 %v1401_v3  ;;  %1237 = vmatpush3.bf16.msra.mxu1 %v1403_v7  ;;  %v1407_v11 = vld [vmem:[%s2038_s4 + $0x18] sm:$0xff]   ;;  %v1408_v12 = vld [vmem:[%s2038_s4 + $0x10] sm:$0xff]   ;;  %v1409_v13 = vld [vmem:[%s2038_s4 + $0x8] sm:$0xff]   ;;  %s1993_s28 = scalar_lea.hbm %s2043_s9, %s1195_s18  ;;  %s1648_s12 = smov [#allocation10]  }
  0x54   : > { %s1162_s23 = sshll.u32 %s417_s17, 3  ;;  %s418_s26 = scalar_lea.vmem %s2034_s0, %s417_s17  ;;  %1230 = vmatprep.subr.bf16.mxu0 %v1645_v0  ;;  %1238 = vmatprep.subr.bf16.mxu1 %v1645_v0  ;;  %v1410_v14 = vld [vmem:[%s2038_s4] sm:$0xff]   ;;  %v1411_v20 = vld [vmem:[%s2039_s5 + $0x38] sm:$0xff]   ;;  %v1412_v21 = vld [vmem:[%s2039_s5 + $0x30] sm:$0xff]   ;;  %v730_v44 = vsub.s32 3, %v1923_v43  ;;  %v735_v45 = vsub.s32 4, %v1923_v43 }
  0x55   : > { %s425_s16 = scalar_lea.vmem %s2035_s1, %s1162_s23  ;;  %v429_v5 = vld [vmem:[%s418_s26] sm:$0x1]  ;;  %v1413_v22 = vld [vmem:[%s2039_s5 + $0x28] sm:$0xff]   ;;  %v1415_v24 = vld [vmem:[%s2039_s5 + $0x18] sm:$0xff]   ;;  %s1647_s17 = smov 96  }
  0x56   : > { %v1844_v1 = vld [vmem:[%s425_s16] sm:$0xff]  ;;  %v434_v6 = vpack.c.bf16 %v429_v5, %v429_v5  ;;  %v1416_v26 = vld [vmem:[%s2039_s5 + $0x10] sm:$0xff]   ;;  %v1417_v30 = vld [vmem:[%s2039_s5 + $0x8] sm:$0xff]   ;;  %v755_v5 = vsub.s32 0, %v1923_v43  ;;  %s413_s23 = sand.u32 1, %s1621_s10   ;;  %s1553_s15 = sshll.u32 %s1648_s12, 4  ;;  %s1554_s15 = int_to_ptr.vmem [resolvable:$false] %s1553_s15 }
  0x57   : > { %v714_v2 = vsel %vm447_vm1, %v1844_v1, 0.0  ;;  %1231 = vmatpush3.bf16.msra.mxu0 %v1402_v4  ;;  %1239 = vmatpush3.bf16.msra.mxu1 %v1404_v8  ;;  %v1414_v23 = vld [vmem:[%s2039_s5 + $0x20] sm:$0xff]   ;;  %s1161_s16 = sshll.u32 %s413_s23, 3  ;;  %s1013_s6 = scalar_lea.sflag [#allocation4], %s413_s23 }
  0x58   : > { %715 = vadd.xlane.f32.xlu0 %v714_v2  ;;  %1256 = vmatprep.subr.bf16.mxu0 %v1645_v0  ;;  %v1909_v25 = vld [vmem:[%s2036_s2] sm:$0xff]  ;;  %s415_s20 = scalar_lea.vmem [#allocation10], %s1161_s16 }
  0x59   : > { %1240 = vmatprep.subr.bf16.mxu1 %v1645_v0  ;;  %v1928_v46 = vrot.slane %v1909_v25, %v730_v44  ;;  %v1931_v49 = vrot.slane %v1909_v25, %v735_v45  ;;  %v1418_v51 = vld [vmem:[%s2039_s5] sm:$0xff]   ;;  %v564_v54 = vrot.slane %v1909_v25, 1  ;;  %v671_v4 = vrot.slane %v1909_v25, 2  ;;  %s1027_s26 = sshll.u32 %s415_s20, 4  ;;  %s1028_s26 = int_to_ptr.vmem [resolvable:$true] %s1027_s26 }
  0x5a   : > { %1233 = vmatmul.mubr.msk.bf16.vlgmr.msra.gmra.mxu0 %vm447_vm1, %v434_v6  ;;  %s1549_s13 = scalar_lea.vmem %s1028_s26, 128  ;;  %p1556_p6 = scmp.lt.s32.totalorder %s1028_s26, %s1554_s15 }
  0x5b   : > { %1272 = vmatprep.mubr.msk.bf16.mxu0 %vm1646_vm0, %v1645_v0  ;;  %1241 = vmatpush3.bf16.msra.mxu1 %v1405_v9  ;;  %p1550_p11 = scmp.ne.s32.totalorder %s1028_s26, %s1549_s13 }
  0x5c   : > { %1242 = vmatprep.subr.bf16.mxu1 %v1645_v0  ;;  %1257 = vmatpush3.bf16.msra.mxu0 %v1411_v20 }
  0x5d   : > { %1258 = vmatprep.subr.bf16.mxu0 %v1645_v0  ;;  %p1551_p13 = pnand %p1550_p11, %p1739_p4 }
  0x5f   : > { %1243 = vmatpush3.bf16.msra.mxu1 %v1406_v10  ;;  %p1552_p0 = pneg %p1551_p13 }
  0x60   : > { %1244 = vmatprep.subr.bf16.mxu1 %v1645_v0  ;;  %1259 = vmatpush3.bf16.msra.mxu0 %v1412_v21 }
  0x61   : > { %1260 = vmatprep.subr.bf16.mxu0 %v1645_v0 }
  0x63   : > { %1245 = vmatpush3.bf16.msra.mxu1 %v1407_v11 }
  0x64   : > { %1246 = vmatprep.subr.bf16.mxu1 %v1645_v0  ;;  %1261 = vmatpush3.bf16.msra.mxu0 %v1413_v22 }
  0x65   : > { %1262 = vmatprep.subr.bf16.mxu0 %v1645_v0 }
  0x67   : > { %1247 = vmatpush3.bf16.msra.mxu1 %v1408_v12  ;;  %v1419_v12 = vld [vmem:[#allocation5 + $0x8] sm:$0xff]  }
  0x68   : > { %1248 = vmatprep.subr.bf16.mxu1 %v1645_v0  ;;  %1263 = vmatpush3.bf16.msra.mxu0 %v1414_v23 }
  0x69   : > { %1264 = vmatprep.subr.bf16.mxu0 %v1645_v0 }
  0x6b   : > { %1249 = vmatpush3.bf16.msra.mxu1 %v1409_v13  ;;  %v1420_v13 = vld [vmem:[#allocation5] sm:$0xff]  }
  0x6c   : > { %1250 = vmatprep.subr.bf16.mxu1 %v1645_v0  ;;  %1265 = vmatpush3.bf16.msra.mxu0 %v1415_v24 }
  0x6d   : > { %1266 = vmatprep.subr.bf16.mxu0 %v1645_v0 }
  0x6f   : > { %1251 = vmatpush3.bf16.msra.mxu1 %v1410_v14 }
  0x70   : > { %1276 = vmatprep.subr.bf16.mxu1 %v1645_v0  ;;  %1267 = vmatpush3.bf16.msra.mxu0 %v1416_v26 }
  0x71   : > { %1268 = vmatprep.subr.bf16.mxu0 %v1645_v0 }
  0x74   : > { %1269 = vmatpush3.bf16.msra.mxu0 %v1417_v30 }
  0x75   : > { %1270 = vmatprep.subr.bf16.mxu0 %v1645_v0 }
  0x78   : > { %1271 = vmatpush3.bf16.msra.mxu0 %v1418_v51  ;;  %v854_v51 = vsub.s32 6, %v1923_v43 }
  0x79   : > { %1284 = vmatprep.subr.bf16.mxu0 %v1645_v0 }
  0xe1   : > { %v716_v15 = vpop.xlane.xlu0 %715 }
  0xe2   : > { %v718_v16 = vmul.f32 0.03125, %v716_v15 }
  0xe4   : > { %v719_v17 = vsub.f32 %v1844_v1, %v718_v16 }
  0xe6   : > { %v720_v18 = vmul.f32 %v719_v17, %v719_v17 }
  0xe8   : > { %v721_v19 = vsel %vm447_vm1, %v720_v18, 0.0 }
  0xe9   : > { %722 = vadd.xlane.f32.xlu0 %v721_v19 }
 0x11a   : > { %v485_v27 = vpop.f32.mrf.mxu0 }
 0x11b   : > { %v486_v28 = vadd.f32 %v485_v27, %v1909_v25 }
 0x11c   : > { %v1234_v29 = vpop.f32.mrf.mxu0 }
 0x11d   : > { %v1166_v31 = vmul.f32 -1.442695, %v486_v28 }
 0x11e   : > { %v488_v32 = vpop.f32.mrf.mxu0 }
 0x11f   : > { %1425 = vpow2.f32 %v1166_v31  ;;  %v777_v31 = vsub.s32 7, %v1923_v43 }
 0x120   : > { %v1235_v33 = vpop.f32.mrf.mxu0 }
 0x121   : > { %v778_v32 = vrot.slane %v1909_v25, %v777_v31 }
 0x12c   : > { %v1426_v34 = vpop.eup %1425 }
 0x12d   : > { %v494_v35 = vadd.f32 1.0, %v1426_v34 }
 0x12f   : > { %1427 = vrcp.f32 %v494_v35 }
 0x13c   : > { %v1428_v36 = vpop.eup %1427 }
 0x13d   : > { %v497_v37 = vmul.f32 %v1428_v36, %v486_v28 }
 0x13f   : > { %v514_v38 = vpack.c.bf16 %v497_v37, %v497_v37 }
 0x141   : > { %1253 = vmatmul.mubr.bf16.vlgmr.msra.gmra.mxu1 %v514_v38 }
 0x142   : > { %1280 = vmatprep.mubr.msk.bf16.mxu1 %vm1646_vm0, %v1645_v0  ;;  %1277 = vmatpush3.bf16.msra.mxu1 %v1419_v12 }
 0x143   : > { %1278 = vmatprep.subr.bf16.mxu1 %v1645_v0 }
 0x146   : > { %1279 = vmatpush3.bf16.msra.mxu1 %v1420_v13 }
 0x147   : > { %1292 = vmatprep.subr.bf16.mxu1 %v1645_v0 }
 0x172   : > { %v723_v39 = vpop.xlane.xlu0 %722 }
 0x173   : > { %v724_v40 = vmul.f32 0.03125, %v723_v39 }
 0x175   : > { %v725_v41 = vadd.f32 1e-05, %v724_v40 }
 0x177   : > { %1429 = vrsqrt.f32 %v725_v41 }
 0x184   : > { %v1430_v47 = vpop.eup %1429 }
 0x185   : > { %v727_v48 = vmul.f32 %v1430_v47, %v719_v17 }
 0x187   : > { %v732_v50 = vmul.f32 %v1928_v46, %v727_v48 }
 0x189   : > { %v737_v52 = vadd.f32 %v1931_v49, %v732_v50  ;;  %v849_v50 = vsub.s32 5, %v1923_v43 }
 0x18b   : > { %v738_v53 = vsel %vm447_vm1, %v737_v52, 0.0 }
 0x18c   : > { %739 = vadd.xlane.f32.xlu1 %v738_v53 }
 0x201   : > { %v600_v55 = vpop.f32.mrf.mxu1 }
 0x202   : > { %v601_v56 = vadd.f32 %v600_v55, %v564_v54  ;;  %v855_v55 = vrot.slane %v1909_v25, %v854_v51 }
 0x203   : > { %v1254_v57 = vpop.f32.mrf.mxu1 }
 0x204   : > { %v622_v58 = vpack.c.bf16 %v601_v56, %v601_v56 }
 0x205   : > { %v603_v59 = vpop.f32.mrf.mxu1 }
 0x206   : > { %1273 = vmatmul.mubr.bf16.vlgmr.msra.gmra.mxu0 %v622_v58 }
 0x207   : > { %v1255_v60 = vpop.f32.mrf.mxu1  ;;  %1288 = vmatprep.mubr.msk.bf16.mxu0 %vm1646_vm0, %v1645_v0 }
 0x215   : > { %v740_v61 = vpop.xlane.xlu1 %739 }
 0x216   : > { %v741_v62 = vmul.f32 0.03125, %v740_v61 }
 0x218   : > { %v742_v63 = vsub.f32 %v737_v52, %v741_v62  ;;  %v850_v52 = vrot.slane %v1909_v25, %v849_v50  ;;  %v949_v25 = vpack.c.bf16 %v1844_v1, %v1844_v1 }
 0x21a   : > { %v743_v2 = vmul.f32 %v742_v63, %v742_v63 }
 0x21c   : > { %v744_v3 = vsel %vm447_vm1, %v743_v2, 0.0  ;;  %v1421_v2 = vld [vmem:[#allocation8 + $0x8] sm:$0xff]  }
 0x21d   : > { %745 = vadd.xlane.f32.xlu1 %v744_v3  ;;  %v1422_v3 = vld [vmem:[#allocation7 + $0x8] sm:$0xff]  }
 0x21e   : > { %1285 = vmatpush3.bf16.msra.mxu0 %v1422_v3 }
 0x21f   : > { %1286 = vmatprep.subr.bf16.mxu0 %v1645_v0 }
 0x2a6   : > { %v746_v14 = vpop.xlane.xlu1 %745 }
 0x2a7   : > { %v747_v15 = vmul.f32 0.03125, %v746_v14 }
 0x2a9   : > { %v748_v16 = vadd.f32 1e-05, %v747_v15 }
 0x2ab   : > { %1431 = vrsqrt.f32 %v748_v16 }
 0x2b8   : > { %v1432_v17 = vpop.eup %1431 }
 0x2b9   : > { %v750_v18 = vmul.f32 %v1432_v17, %v742_v63 }
 0x2bb   : > { %v751_v19 = vmul.f32 %v750_v18, %v1928_v46 }
 0x2bd   : > { %v752_v20 = vadd.f32 %v751_v19, %v1931_v49 }
 0x2c6   : > { %v707_v6 = vpop.f32.mrf.mxu0 }
 0x2c7   : > { %v708_v7 = vadd.f32 %v707_v6, %v671_v4  ;;  %v1423_v4 = vld [vmem:[#allocation8] sm:$0xff]   ;;  %v1424_v6 = vld [vmem:[#allocation7] sm:$0xff]  }
 0x2c8   : > { %v1274_v8 = vpop.f32.mrf.mxu0  ;;  %1287 = vmatpush3.bf16.msra.mxu0 %v1424_v6 }
 0x2c9   : > { %v1948_v9 = vrot.slane %v708_v7, %v755_v5 }
 0x2ca   : > { %v710_v10 = vpop.f32.mrf.mxu0 }
 0x2cb   : > { %759 = vrot.lane.b32.xlu0 %v1948_v9, %s1647_s17  ;;  %v757_v21 = vmul.f32 %v1948_v9, %v752_v20  ;;  %s1555_s17 = scalar_lea.vmem %s1554_s15, 256 }
 0x2cc   : > { %v1275_v11 = vpop.f32.mrf.mxu0  ;;  %p1557_p7 = scmp.lt.s32.totalorder %s1555_s17, %s1549_s13 }
 0x2ce   : > { %p1558_p9 = por %p1557_p7, %p1556_p6 }
 0x2d0   : > { %p1559_p12 = pnand %p1558_p9, %p1552_p0 }
 0x33d   : > { %v1956_v22 = vpop.permute.xlu0 %759 }
 0x33e   : > { %v762_v23 = vadd.f32 %v1956_v22, %v757_v21 }
 0x340   : > { %v1183_v24 = vmul.f32 -1.442695, %v762_v23 }
 0x342   : > { %1433 = vpow2.f32 %v1183_v24  ;;  %v1008_v24 = vsub.s32 1, %v1923_v43 }
 0x34f   : > { %v1434_v26 = vpop.eup %1433 }
 0x350   : > { %v766_v27 = vadd.f32 1.0, %v1434_v26 }
 0x352   : > { %1435 = vrcp.f32 %v766_v27 }
 0x35f   : > { %v1436_v28 = vpop.eup %1435 }
 0x360   : > { %v769_v29 = vmul.f32 %v1436_v28, %v762_v23 }
 0x362   : > { %v774_v30 = vpack.c.bf16 %v769_v29, %v769_v29 }
 0x364   : > { %1281 = vmatmul.mubr.msk.bf16.vlgmr.msra.gmra.mxu1 %vm447_vm1, %v774_v30 }
 0x365   : > { %1296 = vmatprep.mubr.msk.bf16.mxu1 %vm1646_vm0, %v1645_v0  ;;  %1293 = vmatpush3.bf16.msra.mxu1 %v1421_v2 }
 0x366   : > { %1294 = vmatprep.subr.bf16.mxu1 %v1645_v0 }
 0x369   : > { %1295 = vmatpush3.bf16.msra.mxu1 %v1423_v4 }
 0x36c   : > { %1297 = vmatmul.mubr.msk.bf16.vlgmr.msra.gmra.mxu1 %vm447_vm1, %v949_v25 }
 0x424   : > { %v828_v33 = vpop.f32.mrf.mxu1 }
 0x425   : > { %v829_v34 = vadd.f32 %v828_v33, %v778_v32 }
 0x426   : > { %v1282_v35 = vpop.f32.mrf.mxu1 }
 0x427   : > { %v834_v36 = vsel %vm447_vm1, %v829_v34, 0.0 }
 0x428   : > { %835 = vadd.xlane.f32.xlu1 %v834_v36  ;;  %v831_v37 = vpop.f32.mrf.mxu1 }
 0x42a   : > { %v1283_v38 = vpop.f32.mrf.mxu1 }
 0x42c   : > { %v999_v21 = vpop.f32.mrf.mxu1 }
 0x4b1   : > { %v836_v39 = vpop.xlane.xlu1 %835 }
 0x4b2   : > { %v837_v40 = vmul.f32 0.03125, %v836_v39 }
 0x4b4   : > { %v838_v41 = vsub.f32 %v829_v34, %v837_v40 }
 0x4b6   : > { %v839_v42 = vmul.f32 %v838_v41, %v838_v41 }
 0x4b8   : > { %v840_v44 = vsel %vm447_vm1, %v839_v42, 0.0 }
 0x4b9   : > { %841 = vadd.xlane.f32.xlu1 %v840_v44 }
 0x542   : > { %v842_v45 = vpop.xlane.xlu1 %841 }
 0x543   : > { %v843_v47 = vmul.f32 0.03125, %v842_v45 }
 0x545   : > { %v844_v48 = vadd.f32 1e-05, %v843_v47 }
 0x547   : > { %1437 = vrsqrt.f32 %v844_v48 }
 0x554   : > { %v1438_v53 = vpop.eup %1437 }
 0x555   : > { %v846_v54 = vmul.f32 %v1438_v53, %v838_v41 }
 0x557   : > { %v851_v56 = vmul.f32 %v850_v52, %v846_v54 }
 0x559   : > { %v856_v57 = vadd.f32 %v855_v55, %v851_v56 }
 0x55b   : > { %v857_v58 = vsel %vm447_vm1, %v856_v57, 0.0 }
 0x55c   : > { %858 = vadd.xlane.f32.xlu1 %v857_v58 }
 0x5e5   : > { %v859_v59 = vpop.xlane.xlu1 %858 }
 0x5e6   : > { %v860_v60 = vmul.f32 0.03125, %v859_v59 }
 0x5e8   : > { %v861_v61 = vsub.f32 %v856_v57, %v860_v60 }
 0x5ea   : > { %v862_v62 = vmul.f32 %v861_v61, %v861_v61 }
 0x5ec   : > { %v863_v63 = vsel %vm447_vm1, %v862_v62, 0.0 }
 0x5ed   : > { %864 = vadd.xlane.f32.xlu1 %v863_v63 }
 0x676   : > { %v865_v7 = vpop.xlane.xlu1 %864 }
 0x677   : > { %v866_v8 = vmul.f32 0.03125, %v865_v7 }
 0x679   : > { %v867_v10 = vadd.f32 1e-05, %v866_v8 }
 0x67b   : > { %1439 = vrsqrt.f32 %v867_v10 }
 0x688   : > { %v1440_v11 = vpop.eup %1439 }
 0x689   : > { %v869_v12 = vmul.f32 %v1440_v11, %v861_v61 }
 0x68b   : > { %v870_v13 = vmul.f32 %v869_v12, %v1928_v46  ;;  %v1298_v46 = vpop.f32.mrf.mxu1 }
 0x68d   : > { %v871_v14 = vadd.f32 %v870_v13, %v1931_v49  ;;  %v1002_v23 = vpop.f32.mrf.mxu1 }
 0x68f   : > { %v872_v0 = vmul.f32 %v871_v14, %v1948_v9  ;;  %v1299_v49 = vpop.f32.mrf.mxu1  ;;  %v428_v9 = vld [vmem:[%s2036_s2 + $0x8] sm:$0x3] }
 0x690   : > { %v1009_v28 = vrot.slane %v428_v9, %v1008_v24 }
 0x691   : > { %v873_v15 = vadd.f32 %v872_v0, %v1956_v22  ;;  %v889_v22 = vrot.slane %v428_v9, %v755_v5 }
 0x693   : > { %v1187_v1 = vmul.f32 -1.442695, %v873_v15 }
 0x695   : > { %1441 = vpow2.f32 %v1187_v1 }
 0x6a2   : > { %v1442_v16 = vpop.eup %1441 }
 0x6a3   : > { %v877_v17 = vadd.f32 1.0, %v1442_v16 }
 0x6a5   : > { %1443 = vrcp.f32 %v877_v17 }
 0x6b2   : > { %v1444_v18 = vpop.eup %1443 }
 0x6b3   : > { %v880_v19 = vmul.f32 %v1444_v18, %v873_v15 }
 0x6b5   : > { %v885_v20 = vpack.c.bf16 %v880_v19, %v880_v19 }
 0x6b7   : > { %1289 = vmatmul.mubr.msk.bf16.vlgmr.msra.gmra.mxu0 %vm447_vm1, %v885_v20 }
 0x777   : > { %v939_v26 = vpop.f32.mrf.mxu0 }
 0x778   : > { %v940_v27 = vadd.f32 %v939_v26, %v889_v22 }
 0x779   : > { %v1290_v29 = vpop.f32.mrf.mxu0 }
 0x77a   : > { %v1005_v30 = vadd.f32 %v999_v21, %v940_v27 }
 0x77b   : > { %v942_v31 = vpop.f32.mrf.mxu0 }
 0x77c   : > { %v1010_v32 = vadd.f32 %v1009_v28, %v1005_v30 }
 0x77d   : > { %v1291_v5 = vpop.f32.mrf.mxu0 }
 0x77e   : > { %1011 = vst.msk [vmem:[%s415_s20] sm:$0xff] %vm447_vm1, %v1010_v32 }
 0x77f   : > { %1562 = shalt.err (!%p1559_p12)
}
 0x780   : > { %s1563_s27 = scalar_lea.hbm %s1993_s28, 128  ;;  %s1567_s16 = scalar_lea.hbm %s2043_s9, 256 }
 0x781   : > { %p1564_p2 = scmp.ne.s32.totalorder %s1993_s28, %s1563_s27  ;;  %p1568_p5 = scmp.lt.s32.totalorder %s1993_s28, %s2043_s9 }
 0x782   : > { %p1569_p10 = scmp.lt.s32.totalorder %s1567_s16, %s1563_s27 }
 0x783   : > { %p1565_p1 = pnand %p1564_p2, %p1739_p4 }
 0x784   : > { %p1570_p11 = por %p1569_p10, %p1568_p5 }
 0x785   : > { %p1566_p3 = pneg %p1565_p1 }
 0x787   : > { %p1571_p13 = pnand %p1570_p11, %p1566_p3 }
 0x789   : > { %1574 = shalt.err (!%p1571_p13)
}
 0x78a   : > { %1316 = dma.vmem_to_hbm [thread:$0]  (%p1739_p4), %s1028_s26, 128, %s1993_s28, %s1013_s6  }
 0x78b PF: > { %p1343_p0 = scmp.ge.s32.totalorder %s1637_s14, 2  ;;  %s1039_s25 = sand.u32 1, %s1617_s30  }
 0x78c   : > { %s1040_s29 = scalar_lea.sflag [#allocation4], %s1039_s25 }
 0x78d   : > { %p1332_p6 = pnand %p1343_p0, %p1746_p8 }
 0x78f   : > { %p1333_p7 = pneg %p1332_p6 }
 0x791   : > { %1612 = dma.done.wait (%p1333_p7), %s1040_s29, 128  }
 0x792   : > { %1614 = vsyncadd (%p1333_p7), %s1040_s29, 4294967168  ;;  %s25_s14 = sadd.s32 1, %s1637_s14   ;;  %s2055_s12 = sld [smem:[#allocation15_spill]] }
 0x793   : > { %p22_p9 = scmp.ge.s32.totalorder %s25_s14, 4   ;;  %s2056_s13 = sld [smem:[#allocation16_spill]] }
 0x794   : > { %s2057_s30 = smov %s1621_s10  ;;  %s2058_s10 = smov %s1625_s11 }
 0x795   : > { %s2059_s11 = smov %s1752_s22  ;;  %24 = sbr.rel (!%p22_p9) target bundleno = 9 (0x9), region = 111 }
 0x79a   :  { %1045 = vsyncpa [#allocation3], 1 }
 0x79b   :  { %1047 = vsyncpa [#allocation3 + $0x1], 1 }
 0x79c   :  { %1048 = vsyncpa [#allocation6], 1 }
 0x79d   :  { %1049 = vsyncpa [#allocation9], 1 }
 0x79e   :  { %1050 = vsyncpa [#allocation4], 1 }
 0x79f   :  { %1052 = vsyncpa [#allocation4 + $0x1], 1 }

</bundles_post_ra>
